<compile_context>
chip_gen: v7x
topology: tpu7x:2x2x1
jax: 0.10.0
libtpu: 0.0.40
codegen_flags: <defaults>
</compile_context>

<pallas_src>
import math
import functools

import jax
import jax.numpy as jnp
from jax import lax
from jax.experimental import pallas as pl
from jax.experimental.pallas import tpu as pltpu


_PARAM_ORDER = ("wq", "bq", "wk", "bk", "wv", "bv", "wo", "bo")


# ----------------------------- kernel bodies -----------------------------
def _mha_body(qx, kvx,
              wq_ref, bq_ref, wk_ref, bk_ref, wv_ref, bv_ref, wo_ref, bo_ref,
              *, heads, d_k, mask_bias=None):
    """One multi-head attention on VMEM-resident (N, dim) f32 operands."""
    scale = 1.0 / math.sqrt(d_k)

    # Full-width projections: one MXU matmul each; bias + scale applied once.
    q = (jnp.dot(qx, wq_ref[...], preferred_element_type=jnp.float32)
         + bq_ref[...]) * scale
    k = jnp.dot(kvx, wk_ref[...], preferred_element_type=jnp.float32) + bk_ref[...]
    v = jnp.dot(kvx, wv_ref[...], preferred_element_type=jnp.float32) + bv_ref[...]

    head_outs = []
    for h in range(heads):                       # static unroll (tiny head count)
        lo, hi = h * d_k, (h + 1) * d_k
        qh, kh, vh = q[:, lo:hi], k[:, lo:hi], v[:, lo:hi]
        # scores = Qh @ Kh^T : contract last dims of both (no XLU transpose).
        s = lax.dot_general(qh, kh, (((1,), (1,)), ((), ())),
                            preferred_element_type=jnp.float32)
        if mask_bias is not None:
            s = s + mask_bias                    # -1e9 on padded keys
        # Numerically stable softmax over the last dim (matches torch.softmax).
        s = s - jnp.max(s, axis=-1, keepdims=True)
        p = jnp.exp(s)
        p = p / jnp.sum(p, axis=-1, keepdims=True)   # exact divide (review note)
        head_outs.append(jnp.dot(p, vh, preferred_element_type=jnp.float32))

    # Single wide output projection on the lane-concatenated heads.
    concat = jnp.concatenate(head_outs, axis=-1)       # (Nq, dim)
    return jnp.dot(concat, wo_ref[...],
                   preferred_element_type=jnp.float32) + bo_ref[...]


def _att_kernel(user_ref, item_ref,
                wq_ref, bq_ref, wk_ref, bk_ref, wv_ref, bv_ref, wo_ref, bo_ref,
                out_ref, *, heads, d_k, n_user, n_item, n_pad):
    """grid=(2,):
         step 0 -> att_item(item, user, user)  (params block 0)
         step 1 -> att_user(user, item, item)  (params block 1)
    user_ref/item_ref have constant index_maps (fetched once, reused both
    steps); the per-step weight/bias block is selected by its BlockSpec."""
    user = user_ref[...]
    item = item_ref[...]
    is0 = pl.program_id(0) == 0

    # Role selection via a scalar blend (2 scalar-broadcast FMAs on the VPU,
    # hidden under the projection matmuls).
    w0 = jnp.where(is0, jnp.float32(1.0), jnp.float32(0.0))
    qx = w0 * item + (1.0 - w0) * user
    kv = w0 * user + (1.0 - w0) * item

    # Neutralize padded key rows (only when padding actually happened).
    needs_mask = (n_user < n_pad) or (n_item < n_pad)
    if needs_mask:
        valid_kv = jnp.where(is0, jnp.int32(n_user), jnp.int32(n_item))
        key_idx = lax.broadcasted_iota(jnp.int32, (n_pad, n_pad), 1)
        mask_bias = jnp.where(key_idx < valid_kv,
                              jnp.float32(0.0), jnp.float32(-1e9))
    else:
        mask_bias = None

    out = _mha_body(qx, kv,
                    wq_ref, bq_ref, wk_ref, bk_ref, wv_ref, bv_ref,
                    wo_ref, bo_ref,
                    heads=heads, d_k=d_k, mask_bias=mask_bias)
    out_ref[...] = out.astype(out_ref.dtype)


# ----------------------------- wrapper -----------------------------
def _mha_cost(nq, nk, dim, heads):
    d_k = dim // heads
    flops = 2 * nq * dim * dim                 # Q projection
    flops += 2 * 2 * nk * dim * dim            # K, V projections
    flops += 2 * 2 * heads * nq * nk * d_k     # scores + probs @ V
    flops += 2 * nq * dim * dim                # output projection
    transcendentals = heads * nq * nk          # exp
    bytes_accessed = 4 * (2 * nq * dim + 2 * nk * dim + 4 * dim * dim + 4 * dim)
    return flops, transcendentals, bytes_accessed


def att_layer(user_feats, item_feats, params_item, params_user, *, heads):
    """ATTLayer.forward:
    concat([att_item(item,user,user), att_user(user,item,item)], axis=0)."""
    n_user, dim = user_feats.shape
    n_item, _ = item_feats.shape
    d_k = dim // heads

    # Common padded row count so both attentions share one grid=(2,) kernel.
    n_pad = pl.cdiv(max(n_user, n_item), 8) * 8
    user_p = user_feats if n_user == n_pad else jnp.pad(
        user_feats, ((0, n_pad - n_user), (0, 0)))
    item_p = item_feats if n_item == n_pad else jnp.pad(
        item_feats, ((0, n_pad - n_item), (0, 0)))

    # Per-step weight/bias selection via a stacked leading axis + index_map.
    # (Tiny (2,dim,dim)/(2,1,dim) arrays; each block is DMA'd exactly once.)
    stacked = [jnp.stack([params_item[k], params_user[k]], axis=0)
               for k in _PARAM_ORDER]

    feat_spec = pl.BlockSpec((n_pad, dim), lambda i: (0, 0))  # constant: resident
    w_spec = pl.BlockSpec((None, dim, dim), lambda i: (i, 0, 0))
    b_spec = pl.BlockSpec((None, 1, dim), lambda i: (i, 0, 0))
    out_spec = pl.BlockSpec((n_pad, dim), lambda i: (i, 0))

    f0, t0, b0 = _mha_cost(n_item, n_user, dim, heads)
    f1, t1, b1 = _mha_cost(n_user, n_item, dim, heads)

    kernel = functools.partial(_att_kernel, heads=heads, d_k=d_k,
                               n_user=n_user, n_item=n_item, n_pad=n_pad)
    out = pl.pallas_call(
        kernel,
        out_shape=jax.ShapeDtypeStruct((2 * n_pad, dim), jnp.float32),
        grid=(2,),
        in_specs=[feat_spec, feat_spec] + [w_spec, b_spec] * 4,
        out_specs=out_spec,
        compiler_params=pltpu.CompilerParams(
            dimension_semantics=("parallel",)),   # 2 TCs on v7x; loop on v5e/v6e
        cost_estimate=pl.CostEstimate(flops=f0 + f1,
                                      transcendentals=t0 + t1,
                                      bytes_accessed=b0 + b1),
    )(user_p, item_p, *stacked)

    if n_user == n_item == n_pad:
        return out                                 # already the exact concat
    # Drop the garbage rows produced by padded queries.
    return jnp.concatenate([out[:n_item], out[n_pad:n_pad + n_user]], axis=0)


# ---------------- deterministic parameter init (xavier_uniform, zero bias) ----------------
def init_mha_params(key, dim):
    def xavier(k):
        bound = math.sqrt(6.0 / (dim + dim))
        # generated directly in (in_dim, out_dim) layout, i.e. Linear.weight^T
        return jax.random.uniform(k, (dim, dim), jnp.float32, -bound, bound)

    kq, kk, kv, ko = jax.random.split(key, 4)
    zeros_b = jnp.zeros((1, dim), jnp.float32)
    return {
        "wq": xavier(kq), "bq": zeros_b,
        "wk": xavier(kk), "bk": zeros_b,
        "wv": xavier(kv), "bv": zeros_b,
        "wo": xavier(ko), "bo": zeros_b,
    }


# ---------------- pure-JAX reference (for sanity check) ----------------
def mha_ref(qx, kx, vx, p, heads):
    dim = qx.shape[-1]
    d_k = dim // heads
    q = qx @ p["wq"] + p["bq"]
    k = kx @ p["wk"] + p["bk"]
    v = vx @ p["wv"] + p["bv"]
    qh = q.reshape(-1, heads, d_k).transpose(1, 0, 2)
    kh = k.reshape(-1, heads, d_k).transpose(1, 0, 2)
    vh = v.reshape(-1, heads, d_k).transpose(1, 0, 2)
    s = jnp.einsum("hqd,hkd->hqk", qh, kh) / math.sqrt(d_k)
    s = jax.nn.softmax(s, axis=-1)
    o = jnp.einsum("hqk,hkd->hqd", s, vh)
    o = o.transpose(1, 0, 2).reshape(-1, dim)
    return o @ p["wo"] + p["bo"]


def att_layer_ref(user, item, p_item, p_user, heads):
    nu = mha_ref(item, user, user, p_item, heads)
    ni = mha_ref(user, item, item, p_user, heads)
    return jnp.concatenate([nu, ni], axis=0)


if __name__ == "__main__":
    DIM, HEADS = 32, 4

    root = jax.random.PRNGKey(0)
    k_u, k_i, k_pi, k_pu = jax.random.split(root, 4)

    params_item = init_mha_params(k_pi, DIM)   # self.att_item
    params_user = init_mha_params(k_pu, DIM)   # self.att_user

    fwd = jax.jit(att_layer, static_argnames=("heads",))

    # Softmax now uses an exact divide; the remaining slack covers MXU vs. XLA
    # default f32 matmul-precision differences between kernel and reference.
    TOL = 1e-2

    def check(n_user, n_item, tag):
        u = jax.random.normal(jax.random.fold_in(k_u, 131 * n_user + n_item),
                              (n_user, DIM), jnp.float32)
        it = jax.random.normal(jax.random.fold_in(k_i, n_user + 977 * n_item),
                               (n_item, DIM), jnp.float32)
        out = jax.block_until_ready(
            fwd(u, it, params_item, params_user, heads=HEADS))
        ref = att_layer_ref(u, it, params_item, params_user, HEADS)
        assert out.shape == (n_item + n_user, DIM), (tag, out.shape)
        err = float(jnp.max(jnp.abs(out - ref)))
        assert jnp.allclose(out, ref, atol=TOL, rtol=TOL), (tag, err)

    check(8, 8, "equal")         # no padding, no mask, output is the exact concat
    check(8, 16, "item>user")    # user padded to 16, step-0 keys masked
    check(5, 12, "ragged")       # both padded to 16, both key sets masked

    print("KERNEL_OK")
</pallas_src>

<mosaic_0001>
module attributes {stable_mosaic.version = 11 : i64} {
  func.func @_att_kernel(%arg0: i32, %arg1: memref<8x32xf32, #tpu.memory_space<vmem>>, %arg2: memref<8x32xf32, #tpu.memory_space<vmem>>, %arg3: memref<1x32x32xf32, #tpu.memory_space<vmem>>, %arg4: memref<1x1x32xf32, #tpu.memory_space<vmem>>, %arg5: memref<1x32x32xf32, #tpu.memory_space<vmem>>, %arg6: memref<1x1x32xf32, #tpu.memory_space<vmem>>, %arg7: memref<1x32x32xf32, #tpu.memory_space<vmem>>, %arg8: memref<1x1x32xf32, #tpu.memory_space<vmem>>, %arg9: memref<1x32x32xf32, #tpu.memory_space<vmem>>, %arg10: memref<1x1x32xf32, #tpu.memory_space<vmem>>, %arg11: memref<8x32xf32, #tpu.memory_space<vmem>>) attributes {dimension_semantics = [#tpu.dimension_semantics<parallel>], iteration_bounds = array<i64: 2>, scalar_prefetch = 0 : i64, scratch_operands = 0 : i64, tpu.core_type = #tpu.core_type<tc>, window_params = [{pipeline_mode = #tpu.pipeline_mode<synchronous>, transform_indices = @transform_0, window_bounds = array<i64: 8, 32>}, {pipeline_mode = #tpu.pipeline_mode<synchronous>, transform_indices = @transform_1, window_bounds = array<i64: 8, 32>}, {transform_indices = @transform_2, window_bounds = array<i64: 1, 32, 32>}, {transform_indices = @transform_3, window_bounds = array<i64: 1, 1, 32>}, {transform_indices = @transform_4, window_bounds = array<i64: 1, 32, 32>}, {transform_indices = @transform_5, window_bounds = array<i64: 1, 1, 32>}, {transform_indices = @transform_6, window_bounds = array<i64: 1, 32, 32>}, {transform_indices = @transform_7, window_bounds = array<i64: 1, 1, 32>}, {transform_indices = @transform_8, window_bounds = array<i64: 1, 32, 32>}, {transform_indices = @transform_9, window_bounds = array<i64: 1, 1, 32>}, {transform_indices = @transform_10, window_bounds = array<i64: 8, 32>}]} {
    %c0 = arith.constant 0 : index
    %c0_0 = arith.constant 0 : index
    %0 = vector.load %arg1[%c0, %c0_0] : memref<8x32xf32, #tpu.memory_space<vmem>>, vector<8x32xf32>
    %c0_1 = arith.constant 0 : index
    %c0_2 = arith.constant 0 : index
    %1 = vector.load %arg2[%c0_1, %c0_2] : memref<8x32xf32, #tpu.memory_space<vmem>>, vector<8x32xf32>
    %c0_i32 = arith.constant 0 : i32
    %2 = arith.cmpi eq, %arg0, %c0_i32 : i32
    %cst = arith.constant 1.000000e+00 : f32
    %cst_3 = arith.constant 0.000000e+00 : f32
    %3 = arith.select %2, %cst, %cst_3 : f32
    %4 = vector.broadcast %3 : f32 to vector<8x32xf32>
    %5 = arith.mulf %4, %1 : vector<8x32xf32>
    %cst_4 = arith.constant 1.000000e+00 : f32
    %6 = arith.subf %cst_4, %3 : f32
    %7 = vector.broadcast %6 : f32 to vector<8x32xf32>
    %8 = arith.mulf %7, %0 : vector<8x32xf32>
    %9 = arith.addf %5, %8 : vector<8x32xf32>
    %10 = vector.broadcast %3 : f32 to vector<8x32xf32>
    %11 = arith.mulf %10, %0 : vector<8x32xf32>
    %cst_5 = arith.constant 1.000000e+00 : f32
    %12 = arith.subf %cst_5, %3 : f32
    %13 = vector.broadcast %12 : f32 to vector<8x32xf32>
    %14 = arith.mulf %13, %1 : vector<8x32xf32>
    %15 = arith.addf %11, %14 : vector<8x32xf32>
    %c0_6 = arith.constant 0 : index
    %c0_7 = arith.constant 0 : index
    %c0_8 = arith.constant 0 : index
    %16 = vector.load %arg3[%c0_6, %c0_7, %c0_8] : memref<1x32x32xf32, #tpu.memory_space<vmem>>, vector<1x32x32xf32>
    %17 = vector.shape_cast %16 : vector<1x32x32xf32> to vector<32x32xf32>
    %cst_9 = arith.constant dense<0.000000e+00> : vector<8x32xf32>
    %18 = tpu.matmul %9, %17, %cst_9 {dimension_numbers = #tpu.dot_dimension_numbers<[1], [0], [0], [1], [0, 0, 1, 1], [], []>} : vector<8x32xf32>, vector<32x32xf32>, vector<8x32xf32> -> vector<8x32xf32>
    %c0_10 = arith.constant 0 : index
    %c0_11 = arith.constant 0 : index
    %c0_12 = arith.constant 0 : index
    %19 = vector.load %arg4[%c0_10, %c0_11, %c0_12] : memref<1x1x32xf32, #tpu.memory_space<vmem>>, vector<1x1x32xf32>
    %20 = vector.shape_cast %19 : vector<1x1x32xf32> to vector<1x32xf32>
    %21 = vector.broadcast %20 : vector<1x32xf32> to vector<8x32xf32>
    %22 = arith.addf %18, %21 : vector<8x32xf32>
    %cst_13 = arith.constant 0.353553385 : f32
    %23 = vector.broadcast %cst_13 : f32 to vector<8x32xf32>
    %24 = arith.mulf %22, %23 : vector<8x32xf32>
    %c0_14 = arith.constant 0 : index
    %c0_15 = arith.constant 0 : index
    %c0_16 = arith.constant 0 : index
    %25 = vector.load %arg5[%c0_14, %c0_15, %c0_16] : memref<1x32x32xf32, #tpu.memory_space<vmem>>, vector<1x32x32xf32>
    %26 = vector.shape_cast %25 : vector<1x32x32xf32> to vector<32x32xf32>
    %cst_17 = arith.constant dense<0.000000e+00> : vector<8x32xf32>
    %27 = tpu.matmul %15, %26, %cst_17 {dimension_numbers = #tpu.dot_dimension_numbers<[1], [0], [0], [1], [0, 0, 1, 1], [], []>} : vector<8x32xf32>, vector<32x32xf32>, vector<8x32xf32> -> vector<8x32xf32>
    %c0_18 = arith.constant 0 : index
    %c0_19 = arith.constant 0 : index
    %c0_20 = arith.constant 0 : index
    %28 = vector.load %arg6[%c0_18, %c0_19, %c0_20] : memref<1x1x32xf32, #tpu.memory_space<vmem>>, vector<1x1x32xf32>
    %29 = vector.shape_cast %28 : vector<1x1x32xf32> to vector<1x32xf32>
    %30 = vector.broadcast %29 : vector<1x32xf32> to vector<8x32xf32>
    %31 = arith.addf %27, %30 : vector<8x32xf32>
    %c0_21 = arith.constant 0 : index
    %c0_22 = arith.constant 0 : index
    %c0_23 = arith.constant 0 : index
    %32 = vector.load %arg7[%c0_21, %c0_22, %c0_23] : memref<1x32x32xf32, #tpu.memory_space<vmem>>, vector<1x32x32xf32>
    %33 = vector.shape_cast %32 : vector<1x32x32xf32> to vector<32x32xf32>
    %cst_24 = arith.constant dense<0.000000e+00> : vector<8x32xf32>
    %34 = tpu.matmul %15, %33, %cst_24 {dimension_numbers = #tpu.dot_dimension_numbers<[1], [0], [0], [1], [0, 0, 1, 1], [], []>} : vector<8x32xf32>, vector<32x32xf32>, vector<8x32xf32> -> vector<8x32xf32>
    %c0_25 = arith.constant 0 : index
    %c0_26 = arith.constant 0 : index
    %c0_27 = arith.constant 0 : index
    %35 = vector.load %arg8[%c0_25, %c0_26, %c0_27] : memref<1x1x32xf32, #tpu.memory_space<vmem>>, vector<1x1x32xf32>
    %36 = vector.shape_cast %35 : vector<1x1x32xf32> to vector<1x32xf32>
    %37 = vector.broadcast %36 : vector<1x32xf32> to vector<8x32xf32>
    %38 = arith.addf %34, %37 : vector<8x32xf32>
    %39 = vector.extract_strided_slice %24 {offsets = [0, 0], sizes = [8, 8], strides = [1, 1]} : vector<8x32xf32> to vector<8x8xf32>
    %40 = vector.extract_strided_slice %31 {offsets = [0, 0], sizes = [8, 8], strides = [1, 1]} : vector<8x32xf32> to vector<8x8xf32>
    %41 = vector.extract_strided_slice %38 {offsets = [0, 0], sizes = [8, 8], strides = [1, 1]} : vector<8x32xf32> to vector<8x8xf32>
    %cst_28 = arith.constant dense<0.000000e+00> : vector<8x8xf32>
    %42 = tpu.matmul %39, %40, %cst_28 {dimension_numbers = #tpu.dot_dimension_numbers<[1], [1], [0], [0], [0, 0, 1, 0], [], []>} : vector<8x8xf32>, vector<8x8xf32>, vector<8x8xf32> -> vector<8x8xf32>
    %cst_29 = arith.constant dense<0xFF800000> : vector<8xf32>
    %43 = vector.multi_reduction <maximumf>, %42, %cst_29 [1] : vector<8x8xf32> to vector<8xf32>
    %44 = vector.shape_cast %43 : vector<8xf32> to vector<8x1xf32>
    %45 = vector.broadcast %44 : vector<8x1xf32> to vector<8x8xf32>
    %46 = arith.subf %42, %45 : vector<8x8xf32>
    %47 = math.exp %46 : vector<8x8xf32>
    %cst_30 = arith.constant dense<0.000000e+00> : vector<8xf32>
    %48 = vector.multi_reduction <add>, %47, %cst_30 [1] : vector<8x8xf32> to vector<8xf32>
    %49 = vector.shape_cast %48 : vector<8xf32> to vector<8x1xf32>
    %50 = vector.broadcast %49 : vector<8x1xf32> to vector<8x8xf32>
    %51 = arith.divf %47, %50 : vector<8x8xf32>
    %cst_31 = arith.constant dense<0.000000e+00> : vector<8x8xf32>
    %52 = tpu.matmul %51, %41, %cst_31 {dimension_numbers = #tpu.dot_dimension_numbers<[1], [0], [0], [1], [0, 0, 1, 1], [], []>} : vector<8x8xf32>, vector<8x8xf32>, vector<8x8xf32> -> vector<8x8xf32>
    %53 = vector.extract_strided_slice %24 {offsets = [0, 8], sizes = [8, 8], strides = [1, 1]} : vector<8x32xf32> to vector<8x8xf32>
    %54 = vector.extract_strided_slice %31 {offsets = [0, 8], sizes = [8, 8], strides = [1, 1]} : vector<8x32xf32> to vector<8x8xf32>
    %55 = vector.extract_strided_slice %38 {offsets = [0, 8], sizes = [8, 8], strides = [1, 1]} : vector<8x32xf32> to vector<8x8xf32>
    %cst_32 = arith.constant dense<0.000000e+00> : vector<8x8xf32>
    %56 = tpu.matmul %53, %54, %cst_32 {dimension_numbers = #tpu.dot_dimension_numbers<[1], [1], [0], [0], [0, 0, 1, 0], [], []>} : vector<8x8xf32>, vector<8x8xf32>, vector<8x8xf32> -> vector<8x8xf32>
    %cst_33 = arith.constant dense<0xFF800000> : vector<8xf32>
    %57 = vector.multi_reduction <maximumf>, %56, %cst_33 [1] : vector<8x8xf32> to vector<8xf32>
    %58 = vector.shape_cast %57 : vector<8xf32> to vector<8x1xf32>
    %59 = vector.broadcast %58 : vector<8x1xf32> to vector<8x8xf32>
    %60 = arith.subf %56, %59 : vector<8x8xf32>
    %61 = math.exp %60 : vector<8x8xf32>
    %cst_34 = arith.constant dense<0.000000e+00> : vector<8xf32>
    %62 = vector.multi_reduction <add>, %61, %cst_34 [1] : vector<8x8xf32> to vector<8xf32>
    %63 = vector.shape_cast %62 : vector<8xf32> to vector<8x1xf32>
    %64 = vector.broadcast %63 : vector<8x1xf32> to vector<8x8xf32>
    %65 = arith.divf %61, %64 : vector<8x8xf32>
    %cst_35 = arith.constant dense<0.000000e+00> : vector<8x8xf32>
    %66 = tpu.matmul %65, %55, %cst_35 {dimension_numbers = #tpu.dot_dimension_numbers<[1], [0], [0], [1], [0, 0, 1, 1], [], []>} : vector<8x8xf32>, vector<8x8xf32>, vector<8x8xf32> -> vector<8x8xf32>
    %67 = vector.extract_strided_slice %24 {offsets = [0, 16], sizes = [8, 8], strides = [1, 1]} : vector<8x32xf32> to vector<8x8xf32>
    %68 = vector.extract_strided_slice %31 {offsets = [0, 16], sizes = [8, 8], strides = [1, 1]} : vector<8x32xf32> to vector<8x8xf32>
    %69 = vector.extract_strided_slice %38 {offsets = [0, 16], sizes = [8, 8], strides = [1, 1]} : vector<8x32xf32> to vector<8x8xf32>
    %cst_36 = arith.constant dense<0.000000e+00> : vector<8x8xf32>
    %70 = tpu.matmul %67, %68, %cst_36 {dimension_numbers = #tpu.dot_dimension_numbers<[1], [1], [0], [0], [0, 0, 1, 0], [], []>} : vector<8x8xf32>, vector<8x8xf32>, vector<8x8xf32> -> vector<8x8xf32>
    %cst_37 = arith.constant dense<0xFF800000> : vector<8xf32>
    %71 = vector.multi_reduction <maximumf>, %70, %cst_37 [1] : vector<8x8xf32> to vector<8xf32>
    %72 = vector.shape_cast %71 : vector<8xf32> to vector<8x1xf32>
    %73 = vector.broadcast %72 : vector<8x1xf32> to vector<8x8xf32>
    %74 = arith.subf %70, %73 : vector<8x8xf32>
    %75 = math.exp %74 : vector<8x8xf32>
    %cst_38 = arith.constant dense<0.000000e+00> : vector<8xf32>
    %76 = vector.multi_reduction <add>, %75, %cst_38 [1] : vector<8x8xf32> to vector<8xf32>
    %77 = vector.shape_cast %76 : vector<8xf32> to vector<8x1xf32>
    %78 = vector.broadcast %77 : vector<8x1xf32> to vector<8x8xf32>
    %79 = arith.divf %75, %78 : vector<8x8xf32>
    %cst_39 = arith.constant dense<0.000000e+00> : vector<8x8xf32>
    %80 = tpu.matmul %79, %69, %cst_39 {dimension_numbers = #tpu.dot_dimension_numbers<[1], [0], [0], [1], [0, 0, 1, 1], [], []>} : vector<8x8xf32>, vector<8x8xf32>, vector<8x8xf32> -> vector<8x8xf32>
    %81 = vector.extract_strided_slice %24 {offsets = [0, 24], sizes = [8, 8], strides = [1, 1]} : vector<8x32xf32> to vector<8x8xf32>
    %82 = vector.extract_strided_slice %31 {offsets = [0, 24], sizes = [8, 8], strides = [1, 1]} : vector<8x32xf32> to vector<8x8xf32>
    %83 = vector.extract_strided_slice %38 {offsets = [0, 24], sizes = [8, 8], strides = [1, 1]} : vector<8x32xf32> to vector<8x8xf32>
    %cst_40 = arith.constant dense<0.000000e+00> : vector<8x8xf32>
    %84 = tpu.matmul %81, %82, %cst_40 {dimension_numbers = #tpu.dot_dimension_numbers<[1], [1], [0], [0], [0, 0, 1, 0], [], []>} : vector<8x8xf32>, vector<8x8xf32>, vector<8x8xf32> -> vector<8x8xf32>
    %cst_41 = arith.constant dense<0xFF800000> : vector<8xf32>
    %85 = vector.multi_reduction <maximumf>, %84, %cst_41 [1] : vector<8x8xf32> to vector<8xf32>
    %86 = vector.shape_cast %85 : vector<8xf32> to vector<8x1xf32>
    %87 = vector.broadcast %86 : vector<8x1xf32> to vector<8x8xf32>
    %88 = arith.subf %84, %87 : vector<8x8xf32>
    %89 = math.exp %88 : vector<8x8xf32>
    %cst_42 = arith.constant dense<0.000000e+00> : vector<8xf32>
    %90 = vector.multi_reduction <add>, %89, %cst_42 [1] : vector<8x8xf32> to vector<8xf32>
    %91 = vector.shape_cast %90 : vector<8xf32> to vector<8x1xf32>
    %92 = vector.broadcast %91 : vector<8x1xf32> to vector<8x8xf32>
    %93 = arith.divf %89, %92 : vector<8x8xf32>
    %cst_43 = arith.constant dense<0.000000e+00> : vector<8x8xf32>
    %94 = tpu.matmul %93, %83, %cst_43 {dimension_numbers = #tpu.dot_dimension_numbers<[1], [0], [0], [1], [0, 0, 1, 1], [], []>} : vector<8x8xf32>, vector<8x8xf32>, vector<8x8xf32> -> vector<8x8xf32>
    %95 = tpu.concatenate %52, %66, %80, %94 in 1 : vector<8x8xf32>, vector<8x8xf32>, vector<8x8xf32>, vector<8x8xf32> -> vector<8x32xf32>
    %c0_44 = arith.constant 0 : index
    %c0_45 = arith.constant 0 : index
    %c0_46 = arith.constant 0 : index
    %96 = vector.load %arg9[%c0_44, %c0_45, %c0_46] : memref<1x32x32xf32, #tpu.memory_space<vmem>>, vector<1x32x32xf32>
    %97 = vector.shape_cast %96 : vector<1x32x32xf32> to vector<32x32xf32>
    %cst_47 = arith.constant dense<0.000000e+00> : vector<8x32xf32>
    %98 = tpu.matmul %95, %97, %cst_47 {dimension_numbers = #tpu.dot_dimension_numbers<[1], [0], [0], [1], [0, 0, 1, 1], [], []>} : vector<8x32xf32>, vector<32x32xf32>, vector<8x32xf32> -> vector<8x32xf32>
    %c0_48 = arith.constant 0 : index
    %c0_49 = arith.constant 0 : index
    %c0_50 = arith.constant 0 : index
    %99 = vector.load %arg10[%c0_48, %c0_49, %c0_50] : memref<1x1x32xf32, #tpu.memory_space<vmem>>, vector<1x1x32xf32>
    %100 = vector.shape_cast %99 : vector<1x1x32xf32> to vector<1x32xf32>
    %101 = vector.broadcast %100 : vector<1x32xf32> to vector<8x32xf32>
    %102 = arith.addf %98, %101 : vector<8x32xf32>
    %c0_51 = arith.constant 0 : index
    %c0_52 = arith.constant 0 : index
    %103 = vector.load %arg11[%c0_51, %c0_52] : memref<8x32xf32, #tpu.memory_space<vmem>>, vector<8x32xf32>
    tpu.vector_store %arg11[%c0_51, %c0_52], %102 {strides = array<i32>} : memref<8x32xf32, #tpu.memory_space<vmem>>, vector<8x32xf32>,
    return
  }
  func.func @transform_0(%arg0: i32) -> (i32, i32) {
    %c0_i32 = arith.constant 0 : i32
    %c0_i32_0 = arith.constant 0 : i32
    %c0_i32_1 = arith.constant 0 : i32
    return %c0_i32, %c0_i32_0 : i32, i32
  }
  func.func @transform_1(%arg0: i32) -> (i32, i32) {
    %c0_i32 = arith.constant 0 : i32
    %c0_i32_0 = arith.constant 0 : i32
    %c0_i32_1 = arith.constant 0 : i32
    return %c0_i32, %c0_i32_0 : i32, i32
  }
  func.func @transform_2(%arg0: i32) -> (i32, i32, i32) {
    %c0_i32 = arith.constant 0 : i32
    %c0_i32_0 = arith.constant 0 : i32
    %c0_i32_1 = arith.constant 0 : i32
    return %arg0, %c0_i32, %c0_i32_0 : i32, i32, i32
  }
  func.func @transform_3(%arg0: i32) -> (i32, i32, i32) {
    %c0_i32 = arith.constant 0 : i32
    %c0_i32_0 = arith.constant 0 : i32
    %c0_i32_1 = arith.constant 0 : i32
    return %arg0, %c0_i32, %c0_i32_0 : i32, i32, i32
  }
  func.func @transform_4(%arg0: i32) -> (i32, i32, i32) {
    %c0_i32 = arith.constant 0 : i32
    %c0_i32_0 = arith.constant 0 : i32
    %c0_i32_1 = arith.constant 0 : i32
    return %arg0, %c0_i32, %c0_i32_0 : i32, i32, i32
  }
  func.func @transform_5(%arg0: i32) -> (i32, i32, i32) {
    %c0_i32 = arith.constant 0 : i32
    %c0_i32_0 = arith.constant 0 : i32
    %c0_i32_1 = arith.constant 0 : i32
    return %arg0, %c0_i32, %c0_i32_0 : i32, i32, i32
  }
  func.func @transform_6(%arg0: i32) -> (i32, i32, i32) {
    %c0_i32 = arith.constant 0 : i32
    %c0_i32_0 = arith.constant 0 : i32
    %c0_i32_1 = arith.constant 0 : i32
    return %arg0, %c0_i32, %c0_i32_0 : i32, i32, i32
  }
  func.func @transform_7(%arg0: i32) -> (i32, i32, i32) {
    %c0_i32 = arith.constant 0 : i32
    %c0_i32_0 = arith.constant 0 : i32
    %c0_i32_1 = arith.constant 0 : i32
    return %arg0, %c0_i32, %c0_i32_0 : i32, i32, i32
  }
  func.func @transform_8(%arg0: i32) -> (i32, i32, i32) {
    %c0_i32 = arith.constant 0 : i32
    %c0_i32_0 = arith.constant 0 : i32
    %c0_i32_1 = arith.constant 0 : i32
    return %arg0, %c0_i32, %c0_i32_0 : i32, i32, i32
  }
  func.func @transform_9(%arg0: i32) -> (i32, i32, i32) {
    %c0_i32 = arith.constant 0 : i32
    %c0_i32_0 = arith.constant 0 : i32
    %c0_i32_1 = arith.constant 0 : i32
    return %arg0, %c0_i32, %c0_i32_0 : i32, i32, i32
  }
  func.func @transform_10(%arg0: i32) -> (i32, i32) {
    %c0_i32 = arith.constant 0 : i32
    %c0_i32_0 = arith.constant 0 : i32
    return %arg0, %c0_i32 : i32, i32
  }
}

</mosaic_0001>

<bundles_post_ra>
// kernel: att_layer.1
= control target key start
LH: loop header
LB: loop body
LE: loop exit
PB: predicated region body
PF: predicated region fallthrough
CT: control target
= control target key end

     0   :  { %15 = vsyncpa [#allocation3], 0  ;;  %s2245_s0 = inlined_call_operand.vmem [shape: f32[8,32], index: 0, kind: input, shape index: {}]   ;;  %s2246_s1 = inlined_call_operand.vmem [shape: f32[8,32], index: 1, kind: input, shape index: {}]   ;;  %s2247_s2 = inlined_call_operand.vmem [shape: f32[2,32,32], index: 2, kind: input, shape index: {}]   ;;  %s2248_s3 = inlined_call_operand.vmem [shape: f32[2,1,32], index: 3, kind: input, shape index: {}]   ;;  %s2249_s4 = inlined_call_operand.vmem [shape: f32[2,32,32], index: 4, kind: input, shape index: {}]   ;;  %s2250_s5 = inlined_call_operand.vmem [shape: f32[2,1,32], index: 5, kind: input, shape index: {}]   ;;  %s2251_s6 = inlined_call_operand.vmem [shape: f32[2,32,32], index: 6, kind: input, shape index: {}]   ;;  %s2252_s7 = inlined_call_operand.vmem [shape: f32[2,1,32], index: 7, kind: input, shape index: {}]   ;;  %s2253_s8 = inlined_call_operand.vmem [shape: f32[2,32,32], index: 8, kind: input, shape index: {}]   ;;  %s2254_s9 = inlined_call_operand.vmem [shape: f32[2,1,32], index: 9, kind: input, shape index: {}]   ;;  %s2255_s10 = inlined_call_operand.hbm [shape: f32[16,32], index: 10, kind: output, shape index: {}]  }
   0x1   :  { %17 = vsyncpa [#allocation3 + $0x1], 0  ;;  %s2020_s13 = smov 0   ;;  %s2022_s14 = smov 0  }
   0x2   :  { %s2024_s15 = smov 0   ;;  %s2026_s16 = smov 0  }
   0x3 LB: > { %2259 = sst [smem:[#allocation5_spill]] %s1949_s15  ;;  %s2041_s17 = sadd.s32 4294967295, %s1953_s16   ;;  %s1953_s16 = sphi %s2026_s16, %s2264_s16   ;;  %s1949_s15 = sphi %s2024_s15, %s2266_s15   ;;  %s1945_s14 = sphi %s2022_s14, %s2268_s14   ;;  %s1941_s13 = sphi %s2020_s13, %s2267_s13  }
   0x4   : > { %s1642_s18 = sadd.s32 4294967294, %s1953_s16   ;;  %s2045_s19 = sadd.s32 1, %s1953_s16  }
   0x5   : > { %2260 = sst [smem:[#allocation6_spill]] %s2045_s19  ;;  %s280_s20 = sadd.s32 1, %s1949_s15 }
   0x6   : > { %s277_s21 = ssub.s32 %s1953_s16, %s2045_s19  ;;  %p290_p0 = scmp.ne.s32.totalorder %s1949_s15, %s1945_s14 }
   0x7   : > { %p278_p1 = scmp.eq.s32.totalorder %s277_s21, 0  ;;  %p291_p2 = scmp.eq.s32.totalorder %s2041_s17, 1 }
   0x8   : > { %p296_p3 = scmp.ne.s32.totalorder %s1945_s14, %s1941_s13  ;;  %p297_p4 = scmp.eq.s32.totalorder %s1642_s18, 1 }
   0x9   : > { %s2056_s22 = scalar_select %p278_p1, %s1949_s15, %s280_s20  }
   0xa   : > { %p2058_p5 = por %p291_p2, %p290_p0  ;;  %p2062_p6 = por %p297_p4, %p296_p3 }
   0xb   : > { %2261 = sst [smem:[#allocation7_spill]] %s2056_s22  ;;  %p1645_p7 = scmp.ge.s32.totalorder %s1953_s16, 1 }
   0xc   : > { %p377_p8 = scmp.lt.s32.totalorder %s1953_s16, 3 }
   0xe   : > { %p378_p9 = pnand %p1645_p7, %p377_p8 }
   0xf   : > { %p442_p10 = scmp.lt.s32.totalorder (!%p378_p9), %s2041_s17, 1  ;;  %v1955_v0 = vmov (!%p378_p9), 0.0|0.0   ;;  %p476_p11 = scmp.eq.s32.totalorder (!%p378_p9), %s2041_s17, 0  ;;  %vm1956_vm0 = vmmov (!%p378_p9), 0   ;;  %v1957_v1 = vmov (!%p378_p9), 0.0   ;;  %v474_v2 = vld [vmem:[%s2245_s0] sm:$0xff] (!%p378_p9) }
  0x10   : > { %381 = sbr.rel (%p378_p9) target bundleno = 1931 (0x78b), region = 60  ;;  %1809 = vmatprep.subr.bf16.mxu1 (!%p378_p9), %v1955_v0  ;;  %1803 = vmatprep.subr.bf16.mxu0 (!%p378_p9), %v1955_v0  ;;  %v475_v3 = vld [vmem:[%s2246_s1] sm:$0xff] (!%p378_p9)  ;;  %vm498_vm1 = vcmask (!%p378_p9), 261120   ;;  %vm738_vm2 = vcmask (!%p378_p9), 64512   ;;  %s1959_s11 = smov (!%p378_p9), 112   ;;  %vm1408_vm3 = vcmask (!%p378_p9), 130048  }
  0x11   : > { %1738 = vmatprep.mubr.msk.f32.mxu1 (!%p378_p9), %vm1956_vm0, %v1957_v1  ;;  %1727 = vmatprep.mubr.msk.f32.mxu0 (!%p378_p9), %vm1956_vm0, %v1957_v1  ;;  %s1960_s12 = smov (!%p378_p9), 104   ;;  %vm1410_vm4 = vcmask (!%p378_p9), 195584  }
  0x17   : > { %s2073_s25 = scalar_select %p442_p10, %s2041_s17, 1 }
  0x18   : > { %s477_s26 = scalar_select %p476_p11, 1.0, 0.0 }
  0x19   : > { %s2080_s27 = sshll.u32 %s2073_s25, 5  ;;  %s457_s22 = scalar_lea.vmem %s2250_s5, %s2073_s25 }
  0x1a   : > { %s454_s30 = scalar_lea.vmem %s2249_s4, %s2080_s27  ;;  %s446_s18 = scalar_lea.vmem %s2247_s2, %s2080_s27  ;;  %v478_v4 = vstv %s477_s26  ;;  %v1657_v24 = vld [vmem:[%s457_s22] ss:$0 sm:$0xff] }
  0x1b   : > { %v573_v5 = vld [vmem:[%s454_s30] sm:$0xff]  ;;  %v574_v6 = vld [vmem:[%s454_s30 + $0x8] sm:$0xff]  ;;  %s480_s19 = ssub.f32 1.0, %s477_s26  ;;  %v575_v10 = vld [vmem:[%s454_s30 + $0x10] sm:$0xff]  ;;  %v484_v16 = vmul.f32 %v478_v4, %v474_v2  ;;  %v479_v19 = vmul.f32 %v478_v4, %v475_v3  ;;  %s449_s29 = scalar_lea.vmem %s2248_s3, %s2073_s25 }
  0x1c   : > { %v487_v7 = vld [vmem:[%s446_s18] sm:$0xff]  ;;  %v1810_v8 = vpack.c.bf16 %v574_v6, %v573_v5  ;;  %v488_v9 = vld [vmem:[%s446_s18 + $0x8] sm:$0xff]  ;;  %v576_v11 = vld [vmem:[%s454_s30 + $0x18] sm:$0xff]  ;;  %s1958_s30 = smov 120   ;;  %s462_s21 = scalar_lea.vmem %s2251_s6, %s2080_s27 }
  0x1d   : > { %v1804_v12 = vpack.c.bf16 %v488_v9, %v487_v7  ;;  %v489_v13 = vld [vmem:[%s446_s18 + $0x10] sm:$0xff]  ;;  %v490_v14 = vld [vmem:[%s446_s18 + $0x18] sm:$0xff]  ;;  %v481_v15 = vstv %s480_s19  ;;  %v1813_v17 = vpack.c.bf16 %v576_v11, %v575_v10  ;;  %v1655_v25 = vld [vmem:[%s449_s29] ss:$0 sm:$0xff]  ;;  %s465_s22 = scalar_lea.vmem %s2252_s7, %s2073_s25  ;;  %s470_s29 = scalar_lea.vmem %s2253_s8, %s2080_s27 }
  0x1e   : > { %1811 = vmatpush3.bf16.msra.mxu1 %v1810_v8  ;;  %v485_v18 = vmul.f32 %v481_v15, %v475_v3  ;;  %v482_v20 = vmul.f32 %v481_v15, %v474_v2  ;;  %v1807_v21 = vpack.c.bf16 %v490_v14, %v489_v13  ;;  %v657_v33 = vld [vmem:[%s462_s21] sm:$0xff]  ;;  %v658_v34 = vld [vmem:[%s462_s21 + $0x8] sm:$0xff]  ;;  %v659_v35 = vld [vmem:[%s462_s21 + $0x10] sm:$0xff]  ;;  %s1963_s27 = smov 24   ;;  %s473_s15 = scalar_lea.vmem %s2254_s9, %s2073_s25 }
  0x1f   : > { %1805 = vmatpush3.bf16.msra.mxu0 %v1804_v12  ;;  %1812 = vmatprep.subr.bf16.mxu1 %v1955_v0  ;;  %v1816_v36 = vpack.c.bf16 %v658_v34, %v657_v33  ;;  %v660_v37 = vld [vmem:[%s462_s21 + $0x18] sm:$0xff]  ;;  %v1659_v47 = vld [vmem:[%s465_s22] ss:$0 sm:$0xff]  ;;  %s1676_s19 = sshll.u32 %s2041_s17, 7  ;;  %s1964_s17 = smov [#allocation2]  }
  0x20   : > { %1806 = vmatprep.subr.bf16.mxu0 %v1955_v0  ;;  %v486_v22 = vadd.f32 %v485_v18, %v484_v16  ;;  %v483_v23 = vadd.f32 %v482_v20, %v479_v19  ;;  %v1819_v38 = vpack.c.bf16 %v660_v37, %v659_v35  ;;  %v1413_v37 = vld [vmem:[%s470_s29 + $0x8] sm:$0xff] }
  0x22   : > { %1814 = vmatpush3.bf16.msra.mxu1 %v1813_v17 }
  0x23   : > { %1808 = vmatpush3.bf16.msra.mxu0 %v1807_v21  ;;  %1752 = vmatprep.subr.mxu1 %v1957_v1 }
  0x24   : > { %1815 = vmatprep.subr.bf16.mxu0 %v1955_v0 }
  0x25   : > { %1739 = vmatmul.mubr.msk.f32.vlgmr.msra.gmra.mrb[0].mxu1 %vm498_vm1, %v486_v22 }
  0x26   : > { %1728 = vmatmul.mubr.msk.f32.vlgmr.msra.gmra.mrb[0].mxu0 %vm498_vm1, %v483_v23  ;;  %1754 = vmatprep.mubr.msk.f32.mxu1 %vm1956_vm0, %v1957_v1 }
  0x27   : > { %1749 = vmatprep.mubr.msk.f32.mxu0 %vm1956_vm0, %v1957_v1  ;;  %1817 = vmatpush3.bf16.msra.mxu0 %v1816_v36  ;;  %v1412_v36 = vld [vmem:[%s470_s29] sm:$0xff] }
  0x28   : > { %1818 = vmatprep.subr.bf16.mxu0 %v1955_v0 }
  0x2b   : > { %1820 = vmatpush3.bf16.msra.mxu0 %v1819_v38  ;;  %v1822_v38 = vpack.c.bf16 %v1413_v37, %v1412_v36 }
  0x2c   : > { %1772 = vmatprep.subr.mxu0 %v1957_v1 }
  0x2e   : > { %1750 = vmatmul.mubr.msk.f32.vlgmr.msra.gmra.mrb[2].mxu0 %vm498_vm1, %v486_v22 }
  0x2f   : > { %1774 = vmatprep.mubr.msk.f32.mxu0 %vm1956_vm0, %v1957_v1 }
  0xf8   : > { %v653_v26 = vpop.f32.mrb[0].mxu1 }
  0xf9   : > { %v654_v27 = vadd.f32 %v1657_v24, %v653_v26  ;;  %v568_v28 = vpop.f32.mrb[0].mxu0  ;;  %v1740_v29 = vpop.f32.mrb[1].mxu1 }
  0xfa   : > { %v569_v30 = vadd.f32 %v1655_v25, %v568_v28  ;;  %v1729_v31 = vpop.f32.mrb[1].mxu0 }
  0xfb   : > { %901 = vrot.lane.b32.xlu1 %v654_v27, %s1958_s30  ;;  %1753 = vmatpush3.xpose.msk.msra.mxu1 %vm738_vm2, %v654_v27 }
  0xfc   : > { %v572_v32 = vmul.f32 0.35355338, %v569_v30  ;;  %1757 = vmatprep.subr.mxu1 %v1957_v1 }
  0xfe   : > { %1755 = vmatmul.mubr.msk.f32.vlgmr.msra.gmra.mrb[2].mxu1 %vm738_vm2, %v572_v32 }
  0xff   : > { %899 = vrot.lane.b32.xlu1 %v572_v32, %s1958_s30  ;;  %1759 = vmatprep.mubr.msk.f32.mxu1 %vm1956_vm0, %v1957_v1 }
 0x101   : > { %v734_v48 = vpop.f32.mrb[2].mxu0 }
 0x102   : > { %v2139_v49 = vadd.f32 %v1659_v47, %v734_v48  ;;  %v1751_v50 = vpop.f32.mrb[3].mxu0 }
 0x103   : > { %1065 = vrot.lane.b32.xlu1 %v572_v32, %s1959_s11 }
 0x104   : > { %1758 = vmatpush3.msra.mxu1 %v2139_v49 }
 0x105   : > { %1762 = vmatprep.subr.mxu1 %v1957_v1 }
 0x107   : > { %1232 = vrot.lane.b32.xlu1 %v654_v27, %s1960_s12 }
 0x10b   : > { %1230 = vrot.lane.b32.xlu1 %v572_v32, %s1960_s12 }
 0x16d   : > { %v902_v51 = vpop.permute.xlu1 %901 }
 0x171   : > { %v900_v52 = vpop.permute.xlu1 %899 }
 0x175   : > { %v1066_v53 = vpop.permute.xlu1 %1065 }
 0x179   : > { %v1233_v56 = vpop.permute.xlu1 %1232 }
 0x17d   : > { %v1231_v58 = vpop.permute.xlu1 %1230 }
 0x1d1   : > { %v811_v39 = vpop.f32.mrb[2].mxu1 }
 0x1d2   : > { %v1756_v40 = vpop.f32.mrb[3].mxu1  ;;  %v815_v41 = vsel %vm738_vm2, %v811_v39, -inf }
 0x1d3   : > { %816 = vmax.xlane.f32.xlu0 %v815_v41  ;;  %v1415_v40 = vld [vmem:[%s470_s29 + $0x18] sm:$0xff] }
 0x260   : > { %v817_v42 = vpop.xlane.xlu0 %816 }
 0x261   : > { %v818_v43 = vsub.f32 %v811_v39, %v817_v42  ;;  %v1414_v39 = vld [vmem:[%s470_s29 + $0x10] sm:$0xff] }
 0x262   : > { %v1825_v41 = vpack.c.bf16 %v1415_v40, %v1414_v39 }
 0x263   : > { %v819_v44 = vmul.f32 1.442695, %v818_v43 }
 0x265   : > { %1875 = vpow2.f32 %v819_v44 }
 0x26f   : > { %v1876_v45 = vpop.eup %1875 }
 0x270   : > { %v821_v46 = vsel %vm738_vm2, %v1876_v45, 0.0 }
 0x271   : > { %822 = vadd.xlane.f32.xlu0 %v821_v46 }
 0x287   : > { %1067 = vrot.lane.b32.xlu0 %v654_v27, %s1959_s11 }
 0x2fe   : > { %v823_v54 = vpop.xlane.xlu0 %822 }
 0x2ff   : > { %1877 = vrcp.f32 %v823_v54 }
 0x302   : > { %v1068_v55 = vpop.permute.xlu0 %1067 }
 0x303   : > { %1773 = vmatpush3.xpose.msk.msra.mxu0 %vm738_vm2, %v1068_v55 }
 0x304   : > { %1782 = vmatprep.subr.mxu0 %v1957_v1 }
 0x306   : > { %1775 = vmatmul.mubr.msk.f32.vlgmr.msra.gmra.mrb[4].mxu0 %vm738_vm2, %v1066_v53 }
 0x307   : > { %1783 = vmatpush3.xpose.msk.msra.mxu0 %vm738_vm2, %v1233_v56  ;;  %1784 = vmatprep.mubr.msk.f32.mxu0 %vm1956_vm0, %v1957_v1 }
 0x308   : > { %1821 = vmatprep.subr.bf16.mxu0 %v1955_v0 }
 0x309   : > { %v1878_v57 = vpop.eup %1877 }
 0x30a   : > { %v825_v59 = vmul.f32 %v1878_v57, %v1876_v45  ;;  %1785 = vmatmul.mubr.msk.f32.vlgmr.msra.gmra.mrb[6].mxu0 %vm738_vm2, %v1231_v58 }
 0x30b   : > { %1800 = vmatprep.mubr.msk.f32.mxu0 %vm1956_vm0, %v1957_v1  ;;  %1823 = vmatpush3.bf16.msra.mxu0 %v1822_v38 }
 0x30c   : > { %1760 = vmatmul.mubr.msk.f32.vlgmr.msra.gmra.mrb[4].mxu1 %vm738_vm2, %v825_v59  ;;  %1824 = vmatprep.subr.bf16.mxu0 %v1955_v0 }
 0x30d   : > { %1763 = vmatpush3.xpose.msk.msra.mxu1 %vm738_vm2, %v902_v51  ;;  %1764 = vmatprep.mubr.msk.f32.mxu1 %vm1956_vm0, %v1957_v1 }
 0x30e   : > { %1767 = vmatprep.subr.mxu1 %v1957_v1 }
 0x30f   : > { %1826 = vmatpush3.bf16.msra.mxu0 %v1825_v41 }
 0x310   : > { %1765 = vmatmul.mubr.msk.f32.vlgmr.msra.gmra.mrb[6].mxu1 %vm738_vm2, %v900_v52  ;;  %v1673_v52 = vld [vmem:[%s473_s15] ss:$0 sm:$0xff] }
 0x311   : > { %1769 = vmatprep.mubr.msk.f32.mxu1 %vm1956_vm0, %v1957_v1 }
 0x3d9   : > { %v1139_v60 = vpop.f32.mrb[4].mxu0 }
 0x3da   : > { %v1776_v61 = vpop.f32.mrb[5].mxu0  ;;  %v1143_v62 = vsel %vm738_vm2, %v1139_v60, -inf }
 0x3db   : > { %1144 = vmax.xlane.f32.xlu0 %v1143_v62 }
 0x3dd   : > { %v1304_v63 = vpop.f32.mrb[6].mxu0 }
 0x3de   : > { %v1786_v2 = vpop.f32.mrb[7].mxu0  ;;  %v1308_v8 = vsel %vm738_vm2, %v1304_v63, -inf }
 0x3df   : > { %v2163_v3 = vpop.f32.mrb[4].mxu1 }
 0x3e0   : > { %v1761_v4 = vpop.f32.mrb[5].mxu1 }
 0x3e3   : > { %v973_v5 = vpop.f32.mrb[6].mxu1 }
 0x3e4   : > { %v1766_v6 = vpop.f32.mrb[7].mxu1  ;;  %v977_v7 = vsel %vm738_vm2, %v973_v5, -inf }
 0x3e5   : > { %978 = vmax.xlane.f32.xlu1 %v977_v7 }
 0x3e9   : > { %1309 = vmax.xlane.f32.xlu1 %v1308_v8 }
 0x468   : > { %v1145_v9 = vpop.xlane.xlu0 %1144 }
 0x469   : > { %v1146_v10 = vsub.f32 %v1139_v60, %v1145_v9 }
 0x46b   : > { %v1147_v11 = vmul.f32 1.442695, %v1146_v10 }
 0x46d   : > { %1879 = vpow2.f32 %v1147_v11 }
 0x472   : > { %v979_v12 = vpop.xlane.xlu1 %978 }
 0x473   : > { %v980_v20 = vsub.f32 %v973_v5, %v979_v12 }
 0x475   : > { %v981_v21 = vmul.f32 1.442695, %v980_v20 }
 0x476   : > { %v1310_v13 = vpop.xlane.xlu1 %1309 }
 0x477   : > { %v1880_v14 = vpop.eup %1879  ;;  %v1311_v15 = vsub.f32 %v1304_v63, %v1310_v13 }
 0x478   : > { %v1149_v16 = vsel %vm738_vm2, %v1880_v14, 0.0 }
 0x479   : > { %v1312_v17 = vmul.f32 1.442695, %v1311_v15  ;;  %1150 = vadd.xlane.f32.xlu0 %v1149_v16 }
 0x47b   : > { %1881 = vpow2.f32 %v1312_v17 }
 0x47c   : > { %1883 = vpow2.f32 %v981_v21 }
 0x485   : > { %v1882_v18 = vpop.eup %1881 }
 0x486   : > { %v1314_v19 = vsel %vm738_vm2, %v1882_v18, 0.0  ;;  %v1884_v22 = vpop.eup %1883 }
 0x487   : > { %1315 = vadd.xlane.f32.xlu1 %v1314_v19  ;;  %v983_v23 = vsel %vm738_vm2, %v1884_v22, 0.0 }
 0x48f   : > { %989 = vrot.lane.b32.xlu0 %v2139_v49, %s1958_s30  ;;  %s1961_s30 = smov 8  }
 0x498   : > { %1154 = vrot.lane.b32.xlu1 %v2139_v49, %s1959_s11  ;;  %s1962_s11 = smov 16  }
 0x4bc   : > { %984 = vadd.xlane.f32.xlu1 %v983_v23 }
 0x4cd   : > { %1319 = vrot.lane.b32.xlu1 %v2139_v49, %s1960_s12  ;;  %s439_s12 = sand.u32 1, %s1945_s14  }
 0x4ce   : > { %s1646_s18 = sshll.u32 %s439_s12, 3  ;;  %s1498_s25 = scalar_lea.sflag [#allocation3], %s439_s12 }
 0x4cf   : > { %s441_s22 = scalar_lea.vmem [#allocation2], %s1646_s18 }
 0x4d0   : > { %s1511_s26 = sshll.u32 %s441_s22, 4  ;;  %s2204_s26 = int_to_ptr.vmem [resolvable:$true] %s1511_s26 }
 0x506   : > { %v1151_v24 = vpop.xlane.xlu0 %1150 }
 0x50a   : > { %v990_v25 = vpop.permute.xlu0 %989 }
 0x50b   : > { %1768 = vmatpush3.msra.mxu1 %v990_v25 }
 0x50c   : > { %1777 = vmatprep.subr.mxu1 %v1957_v1 }
 0x514   : > { %v1316_v26 = vpop.xlane.xlu1 %1315 }
 0x518   : > { %v1155_v27 = vpop.permute.xlu1 %1154 }
 0x549   : > { %v985_v28 = vpop.xlane.xlu1 %984 }
 0x54a   : > { %1885 = vrcp.f32 %v985_v28 }
 0x54b   : > { %1887 = vrcp.f32 %v1151_v24 }
 0x54c   : > { %1889 = vrcp.f32 %v1316_v26 }
 0x54d   : > { %v1320_v34 = vpop.permute.xlu1 %1319 }
 0x554   : > { %v1886_v29 = vpop.eup %1885 }
 0x555   : > { %v987_v30 = vmul.f32 %v1886_v29, %v1884_v22  ;;  %v1888_v31 = vpop.eup %1887 }
 0x556   : > { %v1153_v32 = vmul.f32 %v1888_v31, %v1880_v14  ;;  %v1890_v33 = vpop.eup %1889 }
 0x557   : > { %1770 = vmatmul.mubr.msk.f32.vlgmr.msra.gmra.mrb[8].mxu1 %vm738_vm2, %v987_v30  ;;  %v1318_v35 = vmul.f32 %v1890_v33, %v1882_v18 }
 0x558   : > { %1778 = vmatpush3.msra.mxu1 %v1155_v27  ;;  %1779 = vmatprep.mubr.msk.f32.mxu1 %vm1956_vm0, %v1957_v1 }
 0x559   : > { %1787 = vmatprep.subr.mxu1 %v1957_v1 }
 0x55b   : > { %1780 = vmatmul.mubr.msk.f32.vlgmr.msra.gmra.mrb[10].mxu1 %vm738_vm2, %v1153_v32 }
 0x55c   : > { %1788 = vmatpush3.msra.mxu1 %v1320_v34  ;;  %1789 = vmatprep.mubr.msk.f32.mxu1 %vm1956_vm0, %v1957_v1 }
 0x55f   : > { %1790 = vmatmul.mubr.msk.f32.vlgmr.msra.gmra.mrb[12].mxu1 %vm738_vm2, %v1318_v35 }
 0x62a   : > { %v1061_v42 = vpop.f32.mrb[8].mxu1 }
 0x62b   : > { %1396 = vrot.lane.b32.xlu0 %v1061_v42, %s1961_s30  ;;  %v1771_v1 = vpop.f32.mrb[9].mxu1  ;;  %s2202_s30 = scalar_lea.hbm %s2255_s10, %s1676_s19 }
 0x62e   : > { %v1226_v43 = vpop.f32.mrb[10].mxu1 }
 0x62f   : > { %1400 = vrot.lane.b32.xlu1 %v1226_v43, %s1962_s11  ;;  %v1781_v44 = vpop.f32.mrb[11].mxu1  ;;  %s1891_s11 = scalar_lea.vmem %s2204_s26, 128 }
 0x630   : > { %p1892_p12 = scmp.ne.s32.totalorder %s2204_s26, %s1891_s11 }
 0x632   : > { %v1391_v45 = vpop.f32.mrb[12].mxu1  ;;  %p1893_p13 = pnand %p1892_p12, %p2058_p5 }
 0x633   : > { %1404 = vrot.lane.b32.xlu0 %v1391_v45, %s1963_s27  ;;  %v1791_v46 = vpop.f32.mrb[13].mxu1  ;;  %s1895_s27 = sshll.u32 %s1964_s17, 4  ;;  %s1896_s27 = int_to_ptr.vmem [resolvable:$false] %s1895_s27 }
 0x634   : > { %p1894_p0 = pneg %p1893_p13  ;;  %s1897_s18 = scalar_lea.vmem %s1896_s27, 256 }
 0x635   : > { %p1898_p1 = scmp.lt.s32.totalorder %s2204_s26, %s1896_s27  ;;  %p1899_p2 = scmp.lt.s32.totalorder %s1897_s18, %s1891_s11 }
 0x637   : > { %p1900_p3 = por %p1899_p2, %p1898_p1 }
 0x639   : > { %p1901_p4 = pnand %p1900_p3, %p1894_p0 }
 0x69d   : > { %v1397_v0 = vpop.permute.xlu0 %1396 }
 0x69e   : > { %v1407_v48 = vsel %vm738_vm2, %v2163_v3, %v1397_v0 }
 0x6a1   : > { %v1401_v47 = vpop.permute.xlu1 %1400 }
 0x6a2   : > { %v1409_v49 = vsel %vm1408_vm3, %v1407_v48, %v1401_v47 }
 0x6a5   : > { %v1405_v50 = vpop.permute.xlu0 %1404 }
 0x6a6   : > { %v1411_v51 = vsel %vm1410_vm4, %v1409_v49, %v1405_v50 }
 0x6a7   : > { %1801 = vmatmul.mubr.msk.f32.vlgmr.msra.gmra.mrb[8].mxu0 %vm498_vm1, %v1411_v51 }
 0x77a   : > { %v1492_v53 = vpop.f32.mrb[8].mxu0 }
 0x77b   : > { %v1493_v54 = vadd.f32 %v1673_v52, %v1492_v53  ;;  %v1802_v55 = vpop.f32.mrb[9].mxu0 }
 0x77d   : > { %1496 = vst.msk [vmem:[%s441_s22] sm:$0xff] %vm498_vm1, %v1493_v54 }
 0x77e   : > { %1904 = shalt.err (!%p1901_p4)
}
 0x77f   : > { %s1905_s12 = scalar_lea.hbm %s2202_s30, 128  ;;  %s1909_s15 = scalar_lea.hbm %s2255_s10, 256 }
 0x780   : > { %p1906_p7 = scmp.ne.s32.totalorder %s2202_s30, %s1905_s12  ;;  %p1910_p10 = scmp.lt.u32.totalorder %s2202_s30, %s2255_s10 }
 0x781   : > { %p1911_p11 = scmp.lt.u32.totalorder %s1909_s15, %s1905_s12  ;;  %p1913_p13 = scmp.lt.u32.totalorder %s1905_s12, %s2202_s30 }
 0x782   : > { %p1907_p8 = pnand %p1906_p7, %p2058_p5 }
 0x783   : > { %p1912_p12 = por %p1911_p11, %p1910_p10 }
 0x784   : > { %p1908_p9 = pneg %p1907_p8 }
 0x785   : > { %p1914_p0 = por %p1913_p13, %p1912_p12 }
 0x787   : > { %p1915_p1 = pnand %p1914_p0, %p1908_p9 }
 0x789   : > { %1918 = shalt.err (!%p1915_p1)
}
 0x78a   : > { %1827 = dma.vmem_to_hbm [thread:$0]  (%p2058_p5), %s2204_s26, 128, %s2202_s30, %s1498_s25  }
 0x78b PF: > { %p1833_p2 = scmp.ge.s32.totalorder %s1953_s16, 2  ;;  %s1523_s28 = sand.u32 1, %s1941_s13  }
 0x78c   : > { %s1524_s29 = scalar_lea.sflag [#allocation3], %s1523_s28 }
 0x78d   : > { %p1830_p3 = pnand %p1833_p2, %p2062_p6 }
 0x78f   : > { %1936 = dma.done.wait (!%p1830_p3), %s1524_s29, 128  }
 0x790   : > { %1938 = vsyncadd (!%p1830_p3), %s1524_s29, 4294967168  ;;  %s2264_s16 = sld [smem:[#allocation6_spill]]  ;;  %s2265_s11 = sld [smem:[#allocation5_spill]] }
 0x791   : > { %s2266_s15 = sld [smem:[#allocation7_spill]]  ;;  %s2267_s13 = smov %s1945_s14 }
 0x796   : > { %p20_p4 = scmp.ge.s32.totalorder %s2264_s16, 4   ;;  %s2268_s14 = smov %s2265_s11 }
 0x798   :  { %22 = sbr.rel (!%p20_p4) target bundleno = 3 (0x3), region = 116 }
 0x79f   :  { %1529 = vsyncpa [#allocation3], 1 }
 0x7a0   :  { %1531 = vsyncpa [#allocation3 + $0x1], 1 }

</bundles_post_ra>
